<compile_context>
chip_gen: v7x
topology: tpu7x:2x2x1
jax: 0.10.0
libtpu: 0.0.40
codegen_flags: <defaults>
</compile_context>

<pallas_src>
import jax
import jax.numpy as jnp
from jax import lax
from jax.experimental import pallas as pl
from jax.experimental.pallas import tpu as pltpu


def linear_add_relu_kernel(x_ref, w_ref, b_ref, o_ref):
    # x: (TB, IN), w: (OUT, IN) (PyTorch layout; MXU contracts the transposed feed),
    # b: (1, OUT) with the +1.37 constant already folded in.
    acc = lax.dot_general(
        x_ref[...],
        w_ref[...],
        dimension_numbers=(((1,), (1,)), ((), ())),   # contract IN with IN
        preferred_element_type=jnp.float32,
    )                                                 # (TB, OUT)
    o_ref[...] = jnp.maximum(acc + b_ref[...], 0.0).astype(o_ref.dtype)


def model_forward(x, weight, bias, *, batch_tile=512):
    """x: (B, IN) f32, weight: (OUT, IN) f32 (PyTorch convention), bias: (OUT,) f32."""
    B, IN = x.shape
    OUT, IN_w = weight.shape
    assert IN == IN_w, "weight inner dim must match x inner dim"

    # Fold the +1.37 constant into the bias once (one tiny XLA add, outside the kernel).
    b_plus = (bias.astype(jnp.float32) + jnp.float32(1.37)).reshape(1, OUT)

    if B <= batch_tile:
        # Overhead-bound regime (e.g. the spec's B=1): single invocation, no grid,
        # no double-buffer pipeline — just VMEM-resident operands.
        return pl.pallas_call(
            linear_add_relu_kernel,
            out_shape=jax.ShapeDtypeStruct((B, OUT), jnp.float32),
            in_specs=[
                pl.BlockSpec(memory_space=pltpu.MemorySpace.VMEM),
                pl.BlockSpec(memory_space=pltpu.MemorySpace.VMEM),
                pl.BlockSpec(memory_space=pltpu.MemorySpace.VMEM),
            ],
            out_specs=pl.BlockSpec(memory_space=pltpu.MemorySpace.VMEM),
        )(x, weight, b_plus)

    # Large-batch path: tile only the batch axis; weight/bias are full-array blocks.
    # TB=512 keeps per-tile VMEM < 1 MiB (fits v5e/v6e/v7x with double-buffer headroom)
    # while amortizing the ~0.35 us per-step overhead.
    grid = (pl.cdiv(B, batch_tile),)
    return pl.pallas_call(
        linear_add_relu_kernel,
        out_shape=jax.ShapeDtypeStruct((B, OUT), jnp.float32),
        grid=grid,
        in_specs=[
            pl.BlockSpec((batch_tile, IN), lambda i: (i, 0)),
            pl.BlockSpec((OUT, IN), lambda i: (0, 0)),
            pl.BlockSpec((1, OUT), lambda i: (0, 0)),
        ],
        out_specs=pl.BlockSpec((batch_tile, OUT), lambda i: (i, 0)),
        compiler_params=pltpu.CompilerParams(
            dimension_semantics=("parallel",),   # lets v7x shard batch across its 2 TCs
        ),
    )(x, weight, b_plus)


if __name__ == "__main__":
    key = jax.random.PRNGKey(0)
    kx, kw, kb, kx2 = jax.random.split(key, 4)

    B, IN, OUT = 1, 16, 20
    x = jax.random.normal(kx, (B, IN), dtype=jnp.float32)
    # Deterministic param init (PyTorch-Linear-like uniform bound 1/sqrt(IN))
    bound = 1.0 / (IN ** 0.5)
    weight = jax.random.uniform(kw, (OUT, IN), minval=-bound, maxval=bound,
                                dtype=jnp.float32)
    bias = jax.random.uniform(kb, (OUT,), minval=-bound, maxval=bound,
                              dtype=jnp.float32)

    # --- Spec-sized case (B=1): no-grid fast path ---
    out = model_forward(x, weight, bias)
    jax.block_until_ready(out)
    ref = jnp.maximum(x @ weight.T + bias + 1.37, 0.0)
    assert out.shape == (B, OUT)
    assert jnp.allclose(out, ref, atol=1e-5, rtol=1e-5)

    # --- Batched case: exercises the gridded (parallel batch-tiled) path ---
    B2 = 2048
    x2 = jax.random.normal(kx2, (B2, IN), dtype=jnp.float32)
    out2 = model_forward(x2, weight, bias)
    jax.block_until_ready(out2)
    ref2 = jnp.maximum(x2 @ weight.T + bias + 1.37, 0.0)
    assert out2.shape == (B2, OUT)
    assert jnp.allclose(out2, ref2, atol=1e-5, rtol=1e-5)

    print("KERNEL_OK")
</pallas_src>

<mosaic_0001>
module attributes {stable_mosaic.version = 11 : i64} {
  func.func @linear_add_relu_kernel(%arg0: memref<1x16xf32, #tpu.memory_space<vmem>>, %arg1: memref<20x16xf32, #tpu.memory_space<vmem>>, %arg2: memref<1x20xf32, #tpu.memory_space<vmem>>, %arg3: memref<1x20xf32, #tpu.memory_space<vmem>>) attributes {dimension_semantics = [], scalar_prefetch = 0 : i64, scratch_operands = 0 : i64, tpu.core_type = #tpu.core_type<tc>} {
    %c0 = arith.constant 0 : index
    %c0_0 = arith.constant 0 : index
    %0 = vector.load %arg0[%c0, %c0_0] : memref<1x16xf32, #tpu.memory_space<vmem>>, vector<1x16xf32>
    %c0_1 = arith.constant 0 : index
    %c0_2 = arith.constant 0 : index
    %1 = vector.load %arg1[%c0_1, %c0_2] : memref<20x16xf32, #tpu.memory_space<vmem>>, vector<20x16xf32>
    %cst = arith.constant dense<0.000000e+00> : vector<1x20xf32>
    %2 = tpu.matmul %0, %1, %cst {dimension_numbers = #tpu.dot_dimension_numbers<[1], [1], [0], [0], [0, 0, 1, 0], [], []>} : vector<1x16xf32>, vector<20x16xf32>, vector<1x20xf32> -> vector<1x20xf32>
    %c0_3 = arith.constant 0 : index
    %c0_4 = arith.constant 0 : index
    %3 = vector.load %arg2[%c0_3, %c0_4] : memref<1x20xf32, #tpu.memory_space<vmem>>, vector<1x20xf32>
    %4 = arith.addf %2, %3 : vector<1x20xf32>
    %cst_5 = arith.constant 0.000000e+00 : f32
    %5 = vector.broadcast %cst_5 : f32 to vector<1x20xf32>
    %6 = arith.maximumf %4, %5 : vector<1x20xf32>
    %c0_6 = arith.constant 0 : index
    %c0_7 = arith.constant 0 : index
    %7 = vector.load %arg3[%c0_6, %c0_7] : memref<1x20xf32, #tpu.memory_space<vmem>>, vector<1x20xf32>
    tpu.vector_store %arg3[%c0_6, %c0_7], %6 {strides = array<i32>} : memref<1x20xf32, #tpu.memory_space<vmem>>, vector<1x20xf32>,
    return
  }
}

</mosaic_0001>

<bundles_post_ra>
// kernel: tpu_custom_call.1
= control target key start
LH: loop header
LB: loop body
LE: loop exit
PB: predicated region body
PF: predicated region fallthrough
CT: control target
= control target key end

     0   :  { %vm20_vm0 = vcmask 130048   ;;  %v169_v2 = vmov 0.0|0.0   ;;  %vm170_vm2 = vmmov 0   ;;  %v171_v4 = vmov 0.0   ;;  %s220_s0 = inlined_call_operand.vmem [shape: f32[1,16], index: 0, kind: input, shape index: {}]   ;;  %s221_s1 = inlined_call_operand.vmem [shape: f32[20,16], index: 1, kind: input, shape index: {}]   ;;  %s222_s2 = inlined_call_operand.vmem [shape: f32[1,20], index: 2, kind: input, shape index: {}]   ;;  %s223_s3 = inlined_call_operand.hbm [shape: f32[1,20], index: 3, kind: output, shape index: {}]  }
   0x1   :  { %v16_v0 = vld [vmem:[%s221_s1] sm:$0xff]  ;;  %v17_v1 = vld [vmem:[%s221_s1 + $0x8] sm:$0xff]  ;;  %137 = vmatprep.subr.bf16.mxu0 %v169_v2  ;;  %vm139_vm1 = vmpackc.low %vm20_vm0, %vm20_vm0  ;;  %134 = vmatprep.mubr.msk.f32.mxu0 %vm170_vm2, %v171_v4 }
   0x2   :  { %v138_v3 = vpack.c.bf16 %v17_v1, %v16_v0 }
   0x3   :  { %8 = vsyncpa [#allocation3], 0  ;;  %v18_v5 = vld [vmem:[%s221_s1 + $0x10] sm:$0xf]  ;;  %v15_v6 = vld [vmem:[%s220_s0] sm:$0x1] }
   0x4   :  { %140 = vmatpush3.bf16.xpose.msk.msra.mxu0 %vm139_vm1, %v138_v3  ;;  %v19_v7 = vld [vmem:[%s222_s2] sm:$0x1]  ;;  %s172_s22 = smov [#allocation2]   ;;  %vm104_vm3 = vcmask 155648  }
   0x5   :  { %132 = vmatprep.subr.mxu0 %v171_v4  ;;  %s112_s23 = sshll.u32 %s172_s22, 4  ;;  %s113_s23 = int_to_ptr.vmem [resolvable:$true] %s112_s23 }
   0x6   :  { %s145_s1 = scalar_lea.vmem %s113_s23, 16  ;;  %s149_s24 = scalar_lea.vmem %s113_s23, 32 }
   0x7   :  { %p146_p0 = scmp.ne.s32.totalorder %s113_s23, %s145_s1  ;;  %p150_p1 = scmp.lt.s32.totalorder %s113_s23, %s113_s23 }
   0x8   :  { %p151_p2 = scmp.lt.s32.totalorder %s149_s24, %s145_s1 }
   0xa   :  { %p152_p3 = por %p151_p2, %p150_p1 }
   0xc   :  { %133 = vmatpush3.xpose.msk.msra.mxu0 %vm20_vm0, %v18_v5  ;;  %p153_p4 = pnand %p152_p3, %p146_p0 }
   0xf   :  { %135 = vmatmul.mubr.msk.f32.vlgmr.msra.gmra.mrb[0].mxu0 %vm20_vm0, %v15_v6 }
  0xe2   :  { %v99_v8 = vpop.f32.mrb[0].mxu0 }
  0xe3   :  { %v100_v9 = vadd.f32 %v99_v8, %v19_v7  ;;  %v136_v10 = vpop.f32.mrb[1].mxu0 }
  0xe5   :  { %v103_v11 = vmax.f32 %v100_v9, 0.0 }
  0xe7   :  { %105 = vst.msk [vmem:[#allocation2] sm:$0x1] %vm104_vm3, %v103_v11 }
  0xe8   :  { %156 = shalt.err (!%p153_p4)
}
  0xe9   :  { %s157_s2 = scalar_lea.hbm %s223_s3, 16 }
  0xea   :  { %p158_p5 = scmp.ne.s32.totalorder %s223_s3, %s157_s2  ;;  %p161_p6 = scmp.lt.u32.totalorder %s157_s2, %s223_s3 }
  0xec   :  { %p163_p7 = pnand %p161_p6, %p158_p5 }
  0xee   :  { %166 = shalt.err (!%p163_p7)
}
  0xef   :  { %115 = dma.vmem_to_hbm [thread:$0]  %s113_s23, 16, %s223_s3, [#allocation3]  }
  0xf0   :  { %167 = dma.done.wait [#allocation3], 16  }
  0xf1   :  { %168 = vsyncadd [#allocation3], 4294967280 }
  0xf2   :  { %119 = vsyncpa [#allocation3], 1 }

</bundles_post_ra>
